<compile_context>
chip_gen: v7x
topology: tpu7x:2x2x1
jax: 0.10.0
libtpu: 0.0.40
codegen_flags: <defaults>
</compile_context>

<pallas_src>
import functools
import math

import jax
import jax.numpy as jnp
from jax import lax
from jax.experimental import pallas as pl
from jax.experimental.pallas import tpu as pltpu

_LANES = 128
_MAX_BLOCK_ROWS = 1024   # (1024,128) f32 = 512 KiB; 2 in x 2 buf = 2 MiB VMEM
_NUM_SPLITS = 2          # leading "parallel" axis -> 2-TC split on v7x


# ----------------------------------------------------------------------------
# Layout helpers
# ----------------------------------------------------------------------------
def _round_up(x, m):
    return -(-x // m) * m


def _as_rows(x, neutral):
    """View a tensor as a (rows, 128) lane-dense 2-D array.

    Zero-copy (pure reshape) when numel is a multiple of 128 and >= 8*128;
    otherwise only the small remainder is padded with a reduction-neutral
    value (log(1)=0 / diff 0).
    """
    flat = x.reshape(-1)
    n = flat.shape[0]
    n_padded = max(_round_up(n, _LANES), 8 * _LANES)
    if n_padded != n:
        pad = jnp.full((n_padded - n,), neutral, dtype=flat.dtype)
        flat = jnp.concatenate([flat, pad])
    return flat.reshape(-1, _LANES)


def _reduction_dims(n_rows):
    """Pick block rows / grid so that block_rows <= n_rows (only the final
    block per split can be a standard ragged boundary block)."""
    rows_per_split = -(-n_rows // _NUM_SPLITS)
    block_rows = max(8, min(_MAX_BLOCK_ROWS, (rows_per_split // 8) * 8))
    total_blocks = -(-n_rows // block_rows)
    blocks_per_split = -(-total_blocks // _NUM_SPLITS)
    return block_rows, total_blocks, blocks_per_split


# ----------------------------------------------------------------------------
# Kernels
# ----------------------------------------------------------------------------
def _sum_log_kernel(x_ref, o_ref, acc_ref, *, n_rows, block_rows,
                    blocks_per_split):
    c = pl.program_id(0)     # split (parallel on v7x)
    i = pl.program_id(1)     # reduction step within the split

    @pl.when(i == 0)
    def _():
        acc_ref[...] = jnp.zeros_like(acc_ref)

    # Mask rows beyond the logical end of the tensor (ragged / clamped block).
    row_start = (c * blocks_per_split + i) * block_rows
    row_ids = row_start + lax.broadcasted_iota(jnp.int32,
                                               (block_rows, _LANES), 0)
    mask = row_ids < n_rows

    x = jnp.where(mask, x_ref[...].astype(jnp.float32), 1.0)   # log(1) = 0
    acc_ref[...] += jnp.sum(jnp.log(x), axis=0, keepdims=True)

    @pl.when(i == pl.num_programs(1) - 1)
    def _():
        o_ref[...] = acc_ref[...].reshape(1, 1, _LANES)


def _sum_sqdiff_kernel(a_ref, b_ref, o_ref, acc_ref, *, n_rows, block_rows,
                       blocks_per_split):
    c = pl.program_id(0)
    i = pl.program_id(1)

    @pl.when(i == 0)
    def _():
        acc_ref[...] = jnp.zeros_like(acc_ref)

    row_start = (c * blocks_per_split + i) * block_rows
    row_ids = row_start + lax.broadcasted_iota(jnp.int32,
                                               (block_rows, _LANES), 0)
    mask = row_ids < n_rows

    d = a_ref[...].astype(jnp.float32) - b_ref[...].astype(jnp.float32)
    d = jnp.where(mask, d, 0.0)
    acc_ref[...] += jnp.sum(d * d, axis=0, keepdims=True)

    @pl.when(i == pl.num_programs(1) - 1)
    def _():
        o_ref[...] = acc_ref[...].reshape(1, 1, _LANES)


# ----------------------------------------------------------------------------
# Wrappers
# ----------------------------------------------------------------------------
def _reduce_call(kernel_fn, arrays, n_rows):
    block_rows, total_blocks, bps = _reduction_dims(n_rows)

    def in_idx(c, i):
        # Clamp fully-out-of-range blocks; the kernel masks them to zero.
        return (jnp.minimum(c * bps + i, total_blocks - 1), 0)

    kernel = functools.partial(kernel_fn, n_rows=n_rows,
                               block_rows=block_rows, blocks_per_split=bps)

    out = pl.pallas_call(
        kernel,
        out_shape=jax.ShapeDtypeStruct((_NUM_SPLITS, 1, _LANES), jnp.float32),
        grid=(_NUM_SPLITS, bps),
        in_specs=[pl.BlockSpec((block_rows, _LANES), in_idx)
                  for _ in arrays],
        out_specs=pl.BlockSpec((1, 1, _LANES), lambda c, i: (c, 0, 0)),
        scratch_shapes=[pltpu.VMEM((1, _LANES), jnp.float32)],
        compiler_params=pltpu.CompilerParams(
            dimension_semantics=("parallel", "arbitrary")),
    )(*arrays)
    # Final tiny cross-split / cross-lane reduce in plain JAX.
    return jnp.sum(out)


def pallas_sum_log(x):
    """sum(log(x)) over all elements of x."""
    x2 = _as_rows(x, neutral=1.0)
    return _reduce_call(_sum_log_kernel, (x2,), x2.shape[0])


def pallas_sum_sqdiff(a, b):
    """sum((a-b)^2) over all elements (a, b same shape)."""
    a2 = _as_rows(a, neutral=0.0)
    b2 = _as_rows(b, neutral=0.0)
    return _reduce_call(_sum_sqdiff_kernel, (a2, b2), a2.shape[0])


# ----------------------------------------------------------------------------
# RateDistortionModelLoss forward (JAX/Pallas)
# ----------------------------------------------------------------------------
def rate_distortion_model_loss(output, target, lmbda=0.01):
    """
    output: dict with
      'likelihoods'   : dict[str, array | None]
      'm_likelihoods' : dict[str, array | None]
      'x_hat'         : array, same shape as target (NCHW)
    target: array, NCHW
    Returns dict with 'bpp_loss', 'mse_loss', 'loss' (float32 scalars).
    """
    N, _, H, W = target.shape
    num_pixels = N * H * W

    # Fuse all likelihood tensors into a single sum(log) launch.
    liks = [l for l in (list(output['likelihoods'].values())
                        + list(output.get('m_likelihoods', {}).values()))
            if l is not None]
    if liks:
        packed = jnp.concatenate([l.reshape(-1) for l in liks])
        bpp_loss = pallas_sum_log(packed) / jnp.float32(
            -math.log(2) * num_pixels)
    else:
        bpp_loss = jnp.float32(0.0)

    n_elems = 1
    for s in target.shape:
        n_elems *= int(s)
    mse_loss = pallas_sum_sqdiff(output['x_hat'], target) / jnp.float32(n_elems)

    loss = jnp.float32(lmbda) * jnp.float32(255.0 ** 2) * mse_loss + bpp_loss
    return {'bpp_loss': bpp_loss, 'mse_loss': mse_loss, 'loss': loss}


# ----------------------------------------------------------------------------
# Main
# ----------------------------------------------------------------------------
if __name__ == "__main__":
    key = jax.random.PRNGKey(0)
    k_t, k_x, k_ly, k_lz, k_my = jax.random.split(key, 5)

    # Small shapes: NCHW image, latent likelihoods, hyper-latent likelihoods.
    N, C, H, W = 2, 3, 16, 16
    target = jax.random.uniform(k_t, (N, C, H, W), dtype=jnp.float32)
    x_hat = target + 0.05 * jax.random.normal(k_x, (N, C, H, W),
                                              dtype=jnp.float32)

    # Likelihood tensors: values in (0, 1].
    lik_y = jax.random.uniform(k_ly, (N, 4, 4, 4), dtype=jnp.float32,
                               minval=0.05, maxval=1.0)
    lik_z = jax.random.uniform(k_lz, (N, 4, 2, 2), dtype=jnp.float32,
                               minval=0.05, maxval=1.0)
    m_lik_y = jax.random.uniform(k_my, (N, 4, 4, 4), dtype=jnp.float32,
                                 minval=0.05, maxval=1.0)

    output = {
        'x_hat': x_hat,
        'likelihoods': {'y': lik_y, 'z': lik_z},
        'm_likelihoods': {'y': m_lik_y, 'z': None},  # None entries are skipped
    }

    out = rate_distortion_model_loss(output, target, lmbda=0.01)
    jax.block_until_ready(out['loss'])

    # Cross-check against a pure-JAX reference.
    num_pixels = N * H * W
    ref_bpp = (jnp.sum(jnp.log(lik_y)) + jnp.sum(jnp.log(lik_z))
               + jnp.sum(jnp.log(m_lik_y))) / (-math.log(2) * num_pixels)
    ref_mse = jnp.mean((x_hat - target) ** 2)
    ref_loss = 0.01 * 255.0 ** 2 * ref_mse + ref_bpp
    assert jnp.allclose(out['bpp_loss'], ref_bpp, rtol=1e-5, atol=1e-5)
    assert jnp.allclose(out['mse_loss'], ref_mse, rtol=1e-5, atol=1e-6)
    assert jnp.allclose(out['loss'], ref_loss, rtol=1e-5, atol=1e-5)

    print("KERNEL_OK")
</pallas_src>

<mosaic_0001>
module attributes {stable_mosaic.version = 11 : i64} {
  func.func @_sum_log_kernel(%arg0: i32, %arg1: i32, %arg2: memref<8x128xf32, #tpu.memory_space<vmem>>, %arg3: memref<1x1x128xf32, #tpu.memory_space<vmem>>, %arg4: memref<1x128xf32, #tpu.memory_space<vmem>>) attributes {dimension_semantics = [#tpu.dimension_semantics<parallel>, #tpu.dimension_semantics<arbitrary>], iteration_bounds = array<i64: 2, 1>, scalar_prefetch = 0 : i64, scratch_operands = 1 : i64, tpu.core_type = #tpu.core_type<tc>, window_params = [{transform_indices = @transform_0, window_bounds = array<i64: 8, 128>}, {transform_indices = @transform_1, window_bounds = array<i64: 1, 1, 128>}]} {
    %c0_i32 = arith.constant 0 : i32
    %0 = arith.cmpi eq, %arg1, %c0_i32 : i32
    %1 = arith.extui %0 : i1 to i32
    %c0_i32_0 = arith.constant 0 : i32
    %2 = arith.cmpi ne, %1, %c0_i32_0 : i32
    scf.if %2 {
      %cst_10 = arith.constant 0.000000e+00 : f32
      %23 = vector.broadcast %cst_10 : f32 to vector<1x128xf32>
      %c0_11 = arith.constant 0 : index
      %c0_12 = arith.constant 0 : index
      %24 = vector.load %arg4[%c0_11, %c0_12] : memref<1x128xf32, #tpu.memory_space<vmem>>, vector<1x128xf32>
      tpu.vector_store %arg4[%c0_11, %c0_12], %23 {strides = array<i32>} : memref<1x128xf32, #tpu.memory_space<vmem>>, vector<1x128xf32>,
    } else {
    }
    %c1_i32 = arith.constant 1 : i32
    %3 = arith.muli %arg0, %c1_i32 : i32
    %4 = arith.addi %3, %arg1 : i32
    %c8_i32 = arith.constant 8 : i32
    %5 = arith.muli %4, %c8_i32 : i32
    %6 = tpu.iota {dimensions = array<i32: 0>} : vector<8x128xi32>
    %7 = vector.broadcast %5 : i32 to vector<8x128xi32>
    %8 = arith.addi %7, %6 : vector<8x128xi32>
    %c8_i32_1 = arith.constant 8 : i32
    %9 = vector.broadcast %c8_i32_1 : i32 to vector<8x128xi32>
    %10 = arith.cmpi slt, %8, %9 : vector<8x128xi32>
    %c0 = arith.constant 0 : index
    %c0_2 = arith.constant 0 : index
    %11 = vector.load %arg2[%c0, %c0_2] : memref<8x128xf32, #tpu.memory_space<vmem>>, vector<8x128xf32>
    %cst = arith.constant 1.000000e+00 : f32
    %12 = vector.broadcast %cst : f32 to vector<8x128xf32>
    %13 = arith.select %10, %11, %12 : vector<8x128xi1>, vector<8x128xf32>
    %c0_3 = arith.constant 0 : index
    %c0_4 = arith.constant 0 : index
    %14 = vector.load %arg4[%c0_3, %c0_4] : memref<1x128xf32, #tpu.memory_space<vmem>>, vector<1x128xf32>
    %15 = math.log %13 : vector<8x128xf32>
    %cst_5 = arith.constant dense<0.000000e+00> : vector<128xf32>
    %16 = vector.multi_reduction <add>, %15, %cst_5 [0] : vector<8x128xf32> to vector<128xf32>
    %17 = vector.shape_cast %16 : vector<128xf32> to vector<1x128xf32>
    %18 = arith.addf %14, %17 : vector<1x128xf32>
    %c0_6 = arith.constant 0 : index
    %c0_7 = arith.constant 0 : index
    %19 = vector.load %arg4[%c0_6, %c0_7] : memref<1x128xf32, #tpu.memory_space<vmem>>, vector<1x128xf32>
    tpu.vector_store %arg4[%c0_6, %c0_7], %18 {strides = array<i32>} : memref<1x128xf32, #tpu.memory_space<vmem>>, vector<1x128xf32>,
    %c0_i32_8 = arith.constant 0 : i32
    %20 = arith.cmpi eq, %arg1, %c0_i32_8 : i32
    %21 = arith.extui %20 : i1 to i32
    %c0_i32_9 = arith.constant 0 : i32
    %22 = arith.cmpi ne, %21, %c0_i32_9 : i32
    scf.if %22 {
      %c0_10 = arith.constant 0 : index
      %c0_11 = arith.constant 0 : index
      %23 = vector.load %arg4[%c0_10, %c0_11] : memref<1x128xf32, #tpu.memory_space<vmem>>, vector<1x128xf32>
      %24 = vector.shape_cast %23 : vector<1x128xf32> to vector<1x1x128xf32>
      %c0_12 = arith.constant 0 : index
      %c0_13 = arith.constant 0 : index
      %c0_14 = arith.constant 0 : index
      %25 = vector.load %arg3[%c0_12, %c0_13, %c0_14] : memref<1x1x128xf32, #tpu.memory_space<vmem>>, vector<1x1x128xf32>
      tpu.vector_store %arg3[%c0_12, %c0_13, %c0_14], %24 {strides = array<i32>} : memref<1x1x128xf32, #tpu.memory_space<vmem>>, vector<1x1x128xf32>,
    } else {
    }
    return
  }
  func.func @transform_0(%arg0: i32, %arg1: i32) -> (i32, i32) {
    %c1_i32 = arith.constant 1 : i32
    %0 = arith.muli %arg0, %c1_i32 : i32
    %1 = arith.addi %0, %arg1 : i32
    %c0_i32 = arith.constant 0 : i32
    %2 = arith.minsi %1, %c0_i32 : i32
    %c0_i32_0 = arith.constant 0 : i32
    %c0_i32_1 = arith.constant 0 : i32
    return %2, %c0_i32_0 : i32, i32
  }
  func.func @transform_1(%arg0: i32, %arg1: i32) -> (i32, i32, i32) {
    %c0_i32 = arith.constant 0 : i32
    %c0_i32_0 = arith.constant 0 : i32
    %c0_i32_1 = arith.constant 0 : i32
    return %arg0, %c0_i32, %c0_i32_0 : i32, i32, i32
  }
}

</mosaic_0001>

<bundles_post_ra>
// kernel: tpu_custom_call.1
= control target key start
LH: loop header
LB: loop body
LE: loop exit
PB: predicated region body
PF: predicated region fallthrough
CT: control target
= control target key end

     0   :  { %6 = vsyncpa [#allocation4], 0  ;;  %s687_s0 = inlined_call_operand.hbm [shape: f32[8,128], index: 0, kind: input, shape index: {}]   ;;  %s688_s1 = inlined_call_operand.hbm [shape: f32[2,1,128], index: 1, kind: output, shape index: {}]  }
   0x1   :  { %8 = vsyncpa [#allocation4 + $0x1], 0 }
   0x2   :  { %9 = vsyncpa [#allocation5], 0 }
   0x3   :  { %11 = vsyncpa [#allocation5 + $0x1], 0  ;;  %s521_s6 = smov 0   ;;  %s523_s7 = smov 0  }
   0x4   :  { %s525_s8 = smov 0   ;;  %s527_s9 = smov 0  }
   0x5   :  { %s529_s10 = smov 0   ;;  %s531_s11 = smov 0  }
   0x6   :  { %s533_s12 = smov 0   ;;  %s535_s13 = smov 0  }
   0x7 LB: > { %s272_s14 = sadd.s32 4294967295, %s506_s13   ;;  %s273_s15 = sadd.s32 4294967294, %s506_s13   ;;  %s506_s13 = sphi %s535_s13, %s17_s13   ;;  %s502_s12 = sphi %s533_s12, %s709_s12   ;;  %s498_s11 = sphi %s531_s11, %s708_s11   ;;  %s494_s10 = sphi %s529_s10, %s677_s10   ;;  %s490_s9 = sphi %s527_s9, %s707_s9   ;;  %s486_s8 = sphi %s525_s8, %s706_s8   ;;  %s482_s7 = sphi %s523_s7, %s705_s7   ;;  %s478_s6 = sphi %s521_s6, %s704_s6  }
   0x8   : > { %s29_s16 = sadd.s32 1, %s502_s12  ;;  %p475_p1 = scmp.ne.s32.totalorder %s494_s10, 0 }
   0x9   : > { %p31_p0 = scmp.ge.s32.totalorder %s29_s16, 2  ;;  %p50_p2 = scmp.eq.s32.totalorder %s506_s13, 0 }
   0xa   : > { %p55_p3 = scmp.ne.s32.totalorder %s494_s10, %s490_s9  ;;  %p56_p5 = scmp.eq.s32.totalorder %s272_s14, 0 }
   0xb   : > { %s711_s16 = smov (%p31_p0, %s29_s16), 0  ;;  %p567_p4 = por %p475_p1, %p50_p2 }
   0xc   : > { %p571_p6 = por %p56_p5, %p55_p3  ;;  %s65_s19 = ssub.s32 %s502_s12, %s711_s16 }
   0xd   : > { %p66_p7 = scmp.eq.s32.totalorder %s65_s19, 0  ;;  %s68_s20 = sadd.s32 1, %s486_s8 }
   0xe   : > { %s693_s18 = scalar_select %p571_p6, 1, 0 }
   0xf   : > { %s579_s21 = scalar_select %p66_p7, %s486_s8, %s68_s20  }
  0x10   : > { %p78_p8 = scmp.ne.s32.totalorder %s486_s8, %s482_s7  ;;  %p79_p9 = scmp.eq.s32.totalorder %s272_s14, 1 }
  0x11   : > { %p84_p10 = scmp.ne.s32.totalorder %s482_s7, %s478_s6  ;;  %p85_p11 = scmp.eq.s32.totalorder %s273_s15, 1 }
  0x12   : > { %p585_p12 = por %p79_p9, %p78_p8  ;;  %p296_p1 = scmp.lt.s32.totalorder %s506_s13, 2 }
  0x13   : > { %p590_p0 = por %p85_p11, %p84_p10  ;;  %s508_s24 = smov [#allocation3]  }
  0x14   : > { %s694_s22 = scalar_select %p585_p12, 1, 0 }
  0x15   : > { %s695_s23 = scalar_select %p590_p0, 1, 0 }
  0x16   : > { %s119_s25 = sshll.u32 %s508_s24, 4  ;;  %p597_p2 = pnand %p296_p1, %p567_p4  ;;  %s120_s25 = int_to_ptr.vmem [resolvable:$true] %s119_s25 }
  0x17   : > { %s373_s29 = scalar_lea.hbm %s687_s0, 128 }
  0x18   : > { %s696_s26 = scalar_select %p597_p2, 1, 0 }
  0x19   : > { %p374_p7 = scmp.ne.s32.totalorder %s687_s0, %s373_s29  ;;  %p375_p8 = pneg %p597_p2 }
  0x1a   : > { %p380_p4 = scmp.lt.u32.totalorder %s373_s29, %s373_s29  ;;  %p382_p11 = scmp.lt.u32.totalorder %s373_s29, %s687_s0 }
  0x1b   : > { %p376_p9 = pnand %p375_p8, %p374_p7 }
  0x1c   : > { %p383_p1 = por %p382_p11, %p380_p4 }
  0x1d   : > { %p377_p10 = pneg %p376_p9 }
  0x1f   : > { %p384_p13 = pnand %p383_p1, %p377_p10 }
  0x21   : > { %387 = shalt.err (!%p384_p13)
}
  0x22   : > { %s388_s5 = scalar_lea.vmem %s120_s25, 128  ;;  %s395_s9 = scalar_lea.vmem %s120_s25, 256 }
  0x23   : > { %p389_p3 = scmp.ne.s32.totalorder %s120_s25, %s388_s5  ;;  %p396_p12 = scmp.lt.s32.totalorder %s120_s25, %s120_s25 }
  0x24   : > { %p397_p6 = scmp.lt.s32.totalorder %s395_s9, %s388_s5 }
  0x25   : > { %p391_p5 = pnand %p389_p3, %p375_p8 }
  0x26   : > { %p398_p2 = por %p397_p6, %p396_p12 }
  0x27   : > { %p392_p0 = pneg %p391_p5 }
  0x29   : > { %p399_p7 = pnand %p398_p2, %p392_p0 }
  0x2b   : > { %402 = shalt.err (!%p399_p7)
}
  0x2c   : > { %p697_p9 = scmp.ne.s32.totalorder %s696_s26, 0  ;;  %p698_p10 = scmp.lt.s32.totalorder %s506_s13, 3 }
  0x2d   : > { %p699_p13 = scmp.ge.s32.totalorder %s506_s13, 1 }
  0x2e   : > { %291 = dma.hbm_to_vmem [thread:$0]  (!%p697_p9), %s687_s0, 128, %s120_s25, [#allocation4]  }
  0x2f   : > { %p125_p4 = pnand %p699_p13, %p698_p10 }
  0x30   : > { %s130_s17 = sand.u32 (!%p125_p4), 1, %s494_s10   ;;  %p700_p6 = scmp.ne.s32.totalorder (!%p125_p4), %s693_s18, 0 }
  0x31   : > { %128 = sbr.rel (%p125_p4) target bundleno = 114 (0x72), region = 24  ;;  %s279_s19 = sshll.u32 (!%p125_p4), %s130_s17, 3 }
  0x32   : > { %s131_s20 = scalar_lea.sflag (!%p125_p4), [#allocation4], %s130_s17  ;;  %s134_s24 = scalar_lea.vmem (!%p125_p4), [#allocation3], %s279_s19 }
  0x38   : > { %468 = dma.done.wait (%p700_p6), %s131_s20, 128  }
  0x39   : > { %470 = vsyncadd (%p700_p6), %s131_s20, 4294967168  ;;  %s280_s26 = sshll.u32 %s498_s11, 3  ;;  %v162_v0 = vlaneseq  ;;  %v509_v1 = vmov 0.0   ;;  %v167_v5 = vld [vmem:[%s134_s24] sm:$0xff]  ;;  %s150_s18 = sand.u32 1, %s482_s7  }
  0x3a   : > { %159 = vst [vmem:[#allocation2] sm:$0x1] %v509_v1  ;;  %v164_v2 = vstv %s280_s26  ;;  %s151_s25 = scalar_lea.vmem [#allocation6], %s150_s18  ;;  %s281_s28 = sshll.u32 %s498_s11, 4 }
  0x3b   : > { %v163_v3 = vshrl.u32 %v162_v0, 7  ;;  %s198_s27 = sshll.u32 %s151_s25, 4  ;;  %s636_s2 = scalar_lea.hbm %s688_s1, %s281_s28  ;;  %s631_s27 = int_to_ptr.vmem [resolvable:$true] %s198_s27 }
  0x3c   : > { %s186_s3 = scalar_lea.sflag [#allocation5], %s150_s18  ;;  %s403_s4 = scalar_lea.vmem %s631_s27, 16 }
  0x3d   : > { %v165_v4 = vadd.s32 %v164_v2, %v163_v3  ;;  %p404_p12 = scmp.ne.s32.totalorder %s631_s27, %s403_s4  ;;  %p701_p0 = scmp.ne.s32.totalorder %s694_s22, 0 }
  0x3e   : > { %s510_s5 = smov [#allocation6]  }
  0x3f   : > { %vm166_vm0 = vcmp.lt.s32.totalorder %v165_v4, 8  ;;  %p405_p2 = pnand %p404_p12, %p701_p0  ;;  %s407_s11 = sshll.u32 %s510_s5, 4  ;;  %s408_s11 = int_to_ptr.vmem [resolvable:$false] %s407_s11 }
  0x40   : > { %v168_v6 = vsel %vm166_vm0, %v167_v5, 1.0  ;;  %s409_s9 = scalar_lea.vmem %s408_s11, 32  ;;  %p410_p5 = scmp.lt.s32.totalorder %s631_s27, %s408_s11 }
  0x41   : > { %371 = vlog2.f32 %v168_v6  ;;  %v169_v14 = vld [vmem:[#allocation2] sm:$0x1]  ;;  %p406_p3 = pneg %p405_p2  ;;  %p411_p8 = scmp.lt.s32.totalorder %s409_s9, %s403_s4 }
  0x43   : > { %p412_p11 = por %p411_p8, %p410_p5 }
  0x45   : > { %p413_p1 = pnand %p412_p11, %p406_p3 }
  0x4b   : > { %v372_v7 = vpop.eup %371 }
  0x4c   : > { %v171_v8 = vmul.f32 0.6931472, %v372_v7 }
  0x4e   : > { %v172_v9 = vrot.slane %v171_v8, 4 }
  0x50   : > { %v173_v10 = vadd.f32 %v172_v9, %v171_v8 }
  0x52   : > { %v174_v11 = vrot.slane %v173_v10, 2 }
  0x54   : > { %v175_v12 = vadd.f32 %v174_v11, %v173_v10 }
  0x56   : > { %v176_v13 = vrot.slane %v175_v12, 1 }
  0x58   : > { %v177_v15 = vadd.f32 %v176_v13, %v175_v12 }
  0x5a   : > { %v178_v16 = vadd.f32 %v177_v15, %v169_v14 }
  0x5c   : > { %179 = vst [vmem:[#allocation2] sm:$0x1] %v178_v16 }
  0x63   : > { %v183_v17 = vld [vmem:[#allocation2] sm:$0x1] }
  0x64   : > { %184 = vst [vmem:[%s151_s25] sm:$0x1] %v183_v17 }
  0x65   : > { %416 = shalt.err (!%p413_p1)
}
  0x66   : > { %s417_s14 = scalar_lea.hbm %s636_s2, 16  ;;  %s421_s19 = scalar_lea.hbm %s688_s1, 32 }
  0x67   : > { %p418_p7 = scmp.ne.s32.totalorder %s636_s2, %s417_s14  ;;  %p422_p13 = scmp.lt.u32.totalorder %s636_s2, %s688_s1 }
  0x68   : > { %p423_p4 = scmp.lt.u32.totalorder %s421_s19, %s417_s14  ;;  %p425_p12 = scmp.lt.u32.totalorder %s417_s14, %s636_s2 }
  0x69   : > { %p419_p9 = pnand %p418_p7, %p701_p0 }
  0x6a   : > { %p424_p6 = por %p423_p4, %p422_p13 }
  0x6b   : > { %p420_p10 = pneg %p419_p9 }
  0x6c   : > { %p426_p2 = por %p425_p12, %p424_p6 }
  0x6e   : > { %p427_p3 = pnand %p426_p2, %p420_p10 }
  0x70   : > { %430 = shalt.err (!%p427_p3)
}
  0x71   : > { %286 = dma.vmem_to_hbm [thread:$0]  (%p701_p0), %s631_s27, 16, %s636_s2, %s186_s3  }
  0x72 PF: > { %s210_s26 = sand.u32 1, %s478_s6   ;;  %p702_p5 = scmp.ne.s32.totalorder %s695_s23, 0 }
  0x73   : > { %p703_p8 = scmp.ge.s32.totalorder %s506_s13, 2  ;;  %s211_s18 = scalar_lea.sflag [#allocation5], %s210_s26 }
  0x75   : > { %p293_p11 = pnand %p703_p8, %p702_p5 }
  0x77   : > { %472 = dma.done.wait (!%p293_p11), %s211_s18, 16  }
  0x78   : > { %474 = vsyncadd (!%p293_p11), %s211_s18, 4294967280  ;;  %s17_s13 = sadd.s32 1, %s506_s13   ;;  %s704_s6 = smov %s482_s7 }
  0x79   : > { %p14_p1 = scmp.ge.s32.totalorder %s17_s13, 4   ;;  %s705_s7 = smov %s486_s8 }
  0x7a   : > { %s706_s8 = smov %s579_s21  ;;  %s707_s9 = smov %s494_s10 }
  0x7b   : > { %s677_s10 = smov 0   ;;  %s708_s11 = smov %s502_s12 }
  0x7c   : > { %s709_s12 = smov %s711_s16  ;;  %16 = sbr.rel (!%p14_p1) target bundleno = 7 (0x7), region = 77 }
  0x83   :  { %215 = vsyncpa [#allocation4], 1 }
  0x84   :  { %217 = vsyncpa [#allocation4 + $0x1], 1 }
  0x85   :  { %218 = vsyncpa [#allocation5], 1 }
  0x86   :  { %220 = vsyncpa [#allocation5 + $0x1], 1 }

</bundles_post_ra>
